<compile_context>
chip_gen: v5e
topology: v5e:2x2
jax: 0.10.0
libtpu: 0.0.40
codegen_flags: <defaults>
</compile_context>

<pallas_src>
import jax
import jax.numpy as jnp
from jax.experimental import pallas as pl
from jax.experimental.pallas import tpu as pltpu


def grunet_kernel(x_ref, h0_ref, wih_ref, whh_ref, bg_ref, bhn_ref,
                  w1_ref, b1_ref, w2_ref, b2_ref, out_ref):
    """Fused: max-pool over seq -> 1-step GRU cell -> dense1+relu -> dense2 (lane-padded)."""
    H = h0_ref.shape[-1]

    # AdaptiveMaxPool1d(1): max over the sequence axis (axis=1 of (B,S,D)).
    xp = jnp.max(x_ref[...], axis=1)                                   # (B, D) f32
    h0 = h0_ref[...]                                                   # (B, H) f32

    # Two zero-free MXU matmuls (bf16 operands, f32 accumulation).
    #   gi = xp @ Wih + [bih_rz + bhh_rz | bih_n]      (r/z biases pre-summed)
    #   gh = h0 @ Whh                                   (hidden n-gate bias added below)
    gi = jnp.dot(xp.astype(wih_ref.dtype), wih_ref[...],
                 preferred_element_type=jnp.float32) + bg_ref[...]     # (B, 3H) f32
    gh = jnp.dot(h0.astype(whh_ref.dtype), whh_ref[...],
                 preferred_element_type=jnp.float32)                   # (B, 3H) f32

    rz = jax.nn.sigmoid(gi[:, :2 * H] + gh[:, :2 * H])                 # (B, 2H)
    r = rz[:, :H]
    z = rz[:, H:]
    gh_n = gh[:, 2 * H:] + bhn_ref[...]                                # (B, H)
    n = jnp.tanh(gi[:, 2 * H:] + r * gh_n)
    h_new = (1.0 - z) * n + z * h0                                     # (B, H) f32

    # dense1 + relu (dropout p=0 at inference); output lane-padded to 128 cols.
    y1 = jnp.dot(h_new.astype(w1_ref.dtype), w1_ref[...],
                 preferred_element_type=jnp.float32) + b1_ref[...]     # (B, 128) f32
    y1 = jnp.maximum(y1, 0.0)

    # dense2 in bf16 (single MXU pass), f32 accumulate, lane-dense padded output.
    y = jnp.dot(y1.astype(w2_ref.dtype), w2_ref[...],
                preferred_element_type=jnp.float32) + b2_ref[...]      # (B, n_pad) f32
    out_ref[...] = y


def grunet_forward(x, h0, dev_params):
    """x: (B, S, D) f32, h0: (B, H) f32 (nn.GRU layer dim squeezed). Returns (B, num_class)."""
    B = x.shape[0]
    n_pad = dev_params["w2p_t"].shape[-1]
    out_dim = dev_params["out_dim"]
    operands = (x, h0,
                dev_params["wih_t"], dev_params["whh_t"],
                dev_params["bg"], dev_params["bhn"],
                dev_params["w1p_t"], dev_params["b1p"],
                dev_params["w2p_t"], dev_params["b2p"])
    y = pl.pallas_call(
        grunet_kernel,
        out_shape=jax.ShapeDtypeStruct((B, n_pad), jnp.float32),
        in_specs=[pl.BlockSpec(memory_space=pltpu.MemorySpace.VMEM)] * len(operands),
        out_specs=pl.BlockSpec(memory_space=pltpu.MemorySpace.VMEM),
    )(*operands)
    return y[:, :out_dim]


def init_params(key, input_dim, hidden_dim, output_dim):
    """Raw f32 parameters, PyTorch layout (pre-transposed to (in, out)); gate order r,z,n."""
    ks = jax.random.split(key, 8)
    scale = 0.05
    return {
        "wih_t": scale * jax.random.normal(ks[0], (input_dim, 3 * hidden_dim), jnp.float32),
        "whh_t": scale * jax.random.normal(ks[1], (hidden_dim, 3 * hidden_dim), jnp.float32),
        "bih":   scale * jax.random.normal(ks[2], (1, 3 * hidden_dim), jnp.float32),
        "bhh":   scale * jax.random.normal(ks[3], (1, 3 * hidden_dim), jnp.float32),
        "w1_t":  scale * jax.random.normal(ks[4], (hidden_dim, 64), jnp.float32),
        "b1":    scale * jax.random.normal(ks[5], (1, 64), jnp.float32),
        "w2_t":  scale * jax.random.normal(ks[6], (64, output_dim), jnp.float32),
        "b2":    scale * jax.random.normal(ks[7], (1, output_dim), jnp.float32),
    }


def prepare_device_params(p, hidden_dim, d1_pad=128):
    """Build the bf16 / padded / bias-folded operands the kernel consumes."""
    H = hidden_dim
    d1 = p["w1_t"].shape[-1]                  # 64
    out_dim = p["w2_t"].shape[-1]
    n_pad = pl.cdiv(out_dim, 128) * 128       # lane-dense output width (handles any num_class)

    bih, bhh = p["bih"], p["bhh"]
    # r/z biases pre-summed onto the gi path; hidden n-gate bias kept separate so the
    # r * (gh_n + bhh_n) term stays exact.
    bg = jnp.concatenate([bih[:, :2 * H] + bhh[:, :2 * H], bih[:, 2 * H:]], axis=1)  # (1, 3H)
    bhn = bhh[:, 2 * H:]                                                             # (1, H)

    # dense1 padded to 128 output columns (zero extra cols), bf16 weight.
    w1p = jnp.zeros((H, d1_pad), jnp.float32).at[:, :d1].set(p["w1_t"]).astype(jnp.bfloat16)
    b1p = jnp.zeros((1, d1_pad), jnp.float32).at[:, :d1].set(p["b1"])

    # dense2 padded to (128, n_pad); extra rows/cols zero, bf16 weight.
    w2p = jnp.zeros((d1_pad, n_pad), jnp.float32).at[:d1, :out_dim].set(p["w2_t"]).astype(jnp.bfloat16)
    b2p = jnp.zeros((1, n_pad), jnp.float32).at[:, :out_dim].set(p["b2"])

    return {
        "wih_t": p["wih_t"].astype(jnp.bfloat16),   # (D, 3H) bf16, zero-free
        "whh_t": p["whh_t"].astype(jnp.bfloat16),   # (H, 3H) bf16, zero-free
        "bg": bg,
        "bhn": bhn,
        "w1p_t": w1p,
        "b1p": b1p,
        "w2p_t": w2p,
        "b2p": b2p,
        "out_dim": out_dim,
    }


def grunet_reference(x, h0, p):
    """Pure-JAX reference mirroring the PyTorch forward (bf16 matmul inputs, f32 math)."""
    H = h0.shape[-1]
    bf = jnp.bfloat16
    xp = jnp.max(x, axis=1)
    gi = jnp.dot(xp.astype(bf), p["wih_t"].astype(bf),
                 preferred_element_type=jnp.float32) + p["bih"]
    gh = jnp.dot(h0.astype(bf), p["whh_t"].astype(bf),
                 preferred_element_type=jnp.float32) + p["bhh"]
    r = jax.nn.sigmoid(gi[:, :H] + gh[:, :H])
    z = jax.nn.sigmoid(gi[:, H:2 * H] + gh[:, H:2 * H])
    n = jnp.tanh(gi[:, 2 * H:] + r * gh[:, 2 * H:])
    h_new = (1.0 - z) * n + z * h0
    y1 = jnp.maximum(jnp.dot(h_new.astype(bf), p["w1_t"].astype(bf),
                             preferred_element_type=jnp.float32) + p["b1"], 0.0)
    return jnp.dot(y1.astype(bf), p["w2_t"].astype(bf),
                   preferred_element_type=jnp.float32) + p["b2"]


if __name__ == "__main__":
    # Shapes implied by accident.__init__: GRUNet(h_dim + h_dim, h_dim, num_class).
    H_DIM = 128
    B, S = 2, 8
    D, H, OUT = 2 * H_DIM, H_DIM, 2

    key = jax.random.PRNGKey(0)
    kx, kh, kp = jax.random.split(key, 3)
    x = jax.random.normal(kx, (B, S, D), jnp.float32)
    h0 = jnp.zeros((B, H), jnp.float32)  # hh = zeros(n_layers, B, h_dim) in accident.forward
    params = init_params(kp, D, H, OUT)
    dev_params = prepare_device_params(params, H)

    out = grunet_forward(x, h0, dev_params)
    out = jax.block_until_ready(out)

    ref = grunet_reference(x, h0, params)
    assert out.shape == (B, OUT)
    assert jnp.allclose(out, ref, rtol=1e-2, atol=1e-2), (out, ref)

    print("KERNEL_OK")
</pallas_src>

<mosaic_0001>
module attributes {stable_mosaic.version = 11 : i64} {
  func.func @grunet_kernel(%arg0: memref<2x8x256xf32, #tpu.memory_space<vmem>>, %arg1: memref<2x128xf32, #tpu.memory_space<vmem>>, %arg2: memref<256x384xbf16, #tpu.memory_space<vmem>>, %arg3: memref<128x384xbf16, #tpu.memory_space<vmem>>, %arg4: memref<1x384xf32, #tpu.memory_space<vmem>>, %arg5: memref<1x128xf32, #tpu.memory_space<vmem>>, %arg6: memref<128x128xbf16, #tpu.memory_space<vmem>>, %arg7: memref<1x128xf32, #tpu.memory_space<vmem>>, %arg8: memref<128x128xbf16, #tpu.memory_space<vmem>>, %arg9: memref<1x128xf32, #tpu.memory_space<vmem>>, %arg10: memref<2x128xf32, #tpu.memory_space<vmem>>) attributes {dimension_semantics = [], scalar_prefetch = 0 : i64, scratch_operands = 0 : i64, tpu.core_type = #tpu.core_type<tc>} {
    %c0 = arith.constant 0 : index
    %c0_0 = arith.constant 0 : index
    %c0_1 = arith.constant 0 : index
    %0 = vector.load %arg0[%c0, %c0_0, %c0_1] : memref<2x8x256xf32, #tpu.memory_space<vmem>>, vector<2x8x256xf32>
    %cst = arith.constant dense<0xFF800000> : vector<2x256xf32>
    %1 = vector.multi_reduction <maximumf>, %0, %cst [1] : vector<2x8x256xf32> to vector<2x256xf32>
    %c0_2 = arith.constant 0 : index
    %c0_3 = arith.constant 0 : index
    %2 = vector.load %arg1[%c0_2, %c0_3] : memref<2x128xf32, #tpu.memory_space<vmem>>, vector<2x128xf32>
    %3 = arith.truncf %1 : vector<2x256xf32> to vector<2x256xbf16>
    %c0_4 = arith.constant 0 : index
    %c0_5 = arith.constant 0 : index
    %4 = vector.load %arg2[%c0_4, %c0_5] : memref<256x384xbf16, #tpu.memory_space<vmem>>, vector<256x384xbf16>
    %cst_6 = arith.constant dense<0.000000e+00> : vector<2x384xf32>
    %5 = tpu.matmul %3, %4, %cst_6 {dimension_numbers = #tpu.dot_dimension_numbers<[1], [0], [0], [1], [0, 0, 1, 1], [], []>} : vector<2x256xbf16>, vector<256x384xbf16>, vector<2x384xf32> -> vector<2x384xf32>
    %c0_7 = arith.constant 0 : index
    %c0_8 = arith.constant 0 : index
    %6 = vector.load %arg4[%c0_7, %c0_8] : memref<1x384xf32, #tpu.memory_space<vmem>>, vector<1x384xf32>
    %7 = vector.broadcast %6 : vector<1x384xf32> to vector<2x384xf32>
    %8 = arith.addf %5, %7 : vector<2x384xf32>
    %9 = arith.truncf %2 : vector<2x128xf32> to vector<2x128xbf16>
    %c0_9 = arith.constant 0 : index
    %c0_10 = arith.constant 0 : index
    %10 = vector.load %arg3[%c0_9, %c0_10] : memref<128x384xbf16, #tpu.memory_space<vmem>>, vector<128x384xbf16>
    %cst_11 = arith.constant dense<0.000000e+00> : vector<2x384xf32>
    %11 = tpu.matmul %9, %10, %cst_11 {dimension_numbers = #tpu.dot_dimension_numbers<[1], [0], [0], [1], [0, 0, 1, 1], [], []>} : vector<2x128xbf16>, vector<128x384xbf16>, vector<2x384xf32> -> vector<2x384xf32>
    %12 = vector.extract_strided_slice %8 {offsets = [0, 0], sizes = [2, 256], strides = [1, 1]} : vector<2x384xf32> to vector<2x256xf32>
    %13 = vector.extract_strided_slice %11 {offsets = [0, 0], sizes = [2, 256], strides = [1, 1]} : vector<2x384xf32> to vector<2x256xf32>
    %14 = arith.addf %12, %13 : vector<2x256xf32>
    %15 = arith.negf %14 : vector<2x256xf32>
    %16 = math.exp %15 : vector<2x256xf32>
    %cst_12 = arith.constant 1.000000e+00 : f32
    %17 = vector.broadcast %cst_12 : f32 to vector<2x256xf32>
    %18 = arith.addf %17, %16 : vector<2x256xf32>
    %19 = arith.divf %17, %18 : vector<2x256xf32>
    %20 = vector.extract_strided_slice %19 {offsets = [0, 0], sizes = [2, 128], strides = [1, 1]} : vector<2x256xf32> to vector<2x128xf32>
    %21 = vector.extract_strided_slice %19 {offsets = [0, 128], sizes = [2, 128], strides = [1, 1]} : vector<2x256xf32> to vector<2x128xf32>
    %22 = vector.extract_strided_slice %11 {offsets = [0, 256], sizes = [2, 128], strides = [1, 1]} : vector<2x384xf32> to vector<2x128xf32>
    %c0_13 = arith.constant 0 : index
    %c0_14 = arith.constant 0 : index
    %23 = vector.load %arg5[%c0_13, %c0_14] : memref<1x128xf32, #tpu.memory_space<vmem>>, vector<1x128xf32>
    %24 = vector.broadcast %23 : vector<1x128xf32> to vector<2x128xf32>
    %25 = arith.addf %22, %24 : vector<2x128xf32>
    %26 = vector.extract_strided_slice %8 {offsets = [0, 256], sizes = [2, 128], strides = [1, 1]} : vector<2x384xf32> to vector<2x128xf32>
    %27 = arith.mulf %20, %25 : vector<2x128xf32>
    %28 = arith.addf %26, %27 : vector<2x128xf32>
    %29 = math.tanh %28 : vector<2x128xf32>
    %cst_15 = arith.constant 1.000000e+00 : f32
    %30 = vector.broadcast %cst_15 : f32 to vector<2x128xf32>
    %31 = arith.subf %30, %21 : vector<2x128xf32>
    %32 = arith.mulf %31, %29 : vector<2x128xf32>
    %33 = arith.mulf %21, %2 : vector<2x128xf32>
    %34 = arith.addf %32, %33 : vector<2x128xf32>
    %35 = arith.truncf %34 : vector<2x128xf32> to vector<2x128xbf16>
    %c0_16 = arith.constant 0 : index
    %c0_17 = arith.constant 0 : index
    %36 = vector.load %arg6[%c0_16, %c0_17] : memref<128x128xbf16, #tpu.memory_space<vmem>>, vector<128x128xbf16>
    %cst_18 = arith.constant dense<0.000000e+00> : vector<2x128xf32>
    %37 = tpu.matmul %35, %36, %cst_18 {dimension_numbers = #tpu.dot_dimension_numbers<[1], [0], [0], [1], [0, 0, 1, 1], [], []>} : vector<2x128xbf16>, vector<128x128xbf16>, vector<2x128xf32> -> vector<2x128xf32>
    %c0_19 = arith.constant 0 : index
    %c0_20 = arith.constant 0 : index
    %38 = vector.load %arg7[%c0_19, %c0_20] : memref<1x128xf32, #tpu.memory_space<vmem>>, vector<1x128xf32>
    %39 = vector.broadcast %38 : vector<1x128xf32> to vector<2x128xf32>
    %40 = arith.addf %37, %39 : vector<2x128xf32>
    %cst_21 = arith.constant 0.000000e+00 : f32
    %41 = vector.broadcast %cst_21 : f32 to vector<2x128xf32>
    %42 = arith.maximumf %40, %41 : vector<2x128xf32>
    %43 = arith.truncf %42 : vector<2x128xf32> to vector<2x128xbf16>
    %c0_22 = arith.constant 0 : index
    %c0_23 = arith.constant 0 : index
    %44 = vector.load %arg8[%c0_22, %c0_23] : memref<128x128xbf16, #tpu.memory_space<vmem>>, vector<128x128xbf16>
    %cst_24 = arith.constant dense<0.000000e+00> : vector<2x128xf32>
    %45 = tpu.matmul %43, %44, %cst_24 {dimension_numbers = #tpu.dot_dimension_numbers<[1], [0], [0], [1], [0, 0, 1, 1], [], []>} : vector<2x128xbf16>, vector<128x128xbf16>, vector<2x128xf32> -> vector<2x128xf32>
    %c0_25 = arith.constant 0 : index
    %c0_26 = arith.constant 0 : index
    %46 = vector.load %arg9[%c0_25, %c0_26] : memref<1x128xf32, #tpu.memory_space<vmem>>, vector<1x128xf32>
    %47 = vector.broadcast %46 : vector<1x128xf32> to vector<2x128xf32>
    %48 = arith.addf %45, %47 : vector<2x128xf32>
    %c0_27 = arith.constant 0 : index
    %c0_28 = arith.constant 0 : index
    %49 = vector.load %arg10[%c0_27, %c0_28] : memref<2x128xf32, #tpu.memory_space<vmem>>, vector<2x128xf32>
    tpu.vector_store %arg10[%c0_27, %c0_28], %48 {strides = array<i32>} : memref<2x128xf32, #tpu.memory_space<vmem>>, vector<2x128xf32>,
    return
  }
}

</mosaic_0001>

<bundles_post_ra>
// kernel: tpu_custom_call.1
= control target key start
LH: loop header
LB: loop body
LE: loop exit
PB: predicated region body
PF: predicated region fallthrough
CT: control target
= control target key end

     0   :  { %15 = vsyncpa [#allocation3], 0  ;;  %s1789_s0 = inlined_call_operand.hbm [shape: f32[2,8,256], index: 0, kind: input, shape index: {}]   ;;  %s1790_s1 = inlined_call_operand.hbm [shape: f32[2,128], index: 1, kind: input, shape index: {}]   ;;  %s1791_s2 = inlined_call_operand.hbm [shape: bf16[256,384], index: 2, kind: input, shape index: {}]   ;;  %s1792_s3 = inlined_call_operand.hbm [shape: bf16[128,384], index: 3, kind: input, shape index: {}]   ;;  %s1793_s4 = inlined_call_operand.vmem [shape: f32[1,384], index: 4, kind: input, shape index: {}]   ;;  %s1794_s5 = inlined_call_operand.vmem [shape: f32[1,128], index: 5, kind: input, shape index: {}]   ;;  %s1795_s6 = inlined_call_operand.hbm [shape: bf16[128,128], index: 6, kind: input, shape index: {}]   ;;  %s1796_s7 = inlined_call_operand.vmem [shape: f32[1,128], index: 7, kind: input, shape index: {}]   ;;  %s1797_s8 = inlined_call_operand.hbm [shape: bf16[128,128], index: 8, kind: input, shape index: {}]   ;;  %s1798_s9 = inlined_call_operand.vmem [shape: f32[1,128], index: 9, kind: input, shape index: {}]   ;;  %s1799_s10 = inlined_call_operand.hbm [shape: f32[2,128], index: 10, kind: output, shape index: {}]  }
   0x1   :  { %16 = vsyncpa [#allocation6], 0 }
   0x2   :  { %17 = vsyncpa [#allocation9], 0 }
   0x3   :  { %18 = vsyncpa [#allocation12], 0  ;;  %s38_s15 = sshll.u32 %s1790_s1, 4  ;;  %s39_s15 = int_to_ptr.hbm [resolvable:$true] %s38_s15 }
   0x4   :  { %19 = vsyncpa [#allocation4], 0  ;;  %s1666_s16 = smov [#allocation5]   ;;  %s61_s20 = sshll.u32 %s1792_s3, 4  ;;  %s62_s20 = int_to_ptr.hbm [resolvable:$true] %s61_s20 }
   0x5   :  { %s40_s17 = sshll.u32 %s1666_s16, 4  ;;  %s1667_s21 = smov [#allocation8]   ;;  %s41_s17 = int_to_ptr.vmem [resolvable:$true] %s40_s17 }
   0x6   :  { %43 = dma.hbm_to_vmem [thread:$0]  %s39_s15, 32, %s41_s17, [#allocation6]  }
   0x7   :  { %s63_s22 = sshll.u32 %s1667_s21, 4  ;;  %s24_s25 = sshll.u32 %s1789_s0, 4  ;;  %s64_s22 = int_to_ptr.vmem [resolvable:$true] %s63_s22  ;;  %s25_s25 = int_to_ptr.hbm [resolvable:$true] %s24_s25 }
   0x8   :  { %s1668_s1 = smov 192   ;;  %s1669_s26 = smov 12  }
   0x9   :  { %69 = dma.hbm_to_vmem [thread:$0]  %s62_s20, 3072, %s64_s22, [#allocation9], %s1668_s1, %s1668_s1, %s1669_s26  }
   0xa   :  { %s1670_s27 = smov [#allocation2]   ;;  %s48_s11 = sshll.u32 %s1791_s2, 4  ;;  %s49_s11 = int_to_ptr.hbm [resolvable:$true] %s48_s11 }
   0xb   :  { %s26_s28 = sshll.u32 %s1670_s27, 4  ;;  %s1671_s3 = smov 256   ;;  %s27_s28 = int_to_ptr.vmem [resolvable:$true] %s26_s28 }
   0xc   :  { %s1672_s12 = smov 16   ;;  %s1673_s13 = smov [#allocation7]  }
   0xd   :  { %32 = dma.hbm_to_vmem [thread:$0]  %s25_s25, 512, %s27_s28, [#allocation3], %s1671_s3, %s1671_s3, %s1672_s12  }
   0xe   :  { %s50_s14 = sshll.u32 %s1673_s13, 4  ;;  %s78_s16 = sshll.u32 %s1795_s6, 4  ;;  %s51_s14 = int_to_ptr.vmem [resolvable:$true] %s50_s14  ;;  %s79_s16 = int_to_ptr.hbm [resolvable:$true] %s78_s16 }
   0xf   :  { %56 = dma.hbm_to_vmem [thread:$0]  %s49_s11, 6144, %s51_s14, [#allocation6], %s1668_s1, %s1668_s1, %s1669_s26  }
  0x10   :  { %s1674_s17 = smov [#allocation10]   ;;  %s93_s2 = sshll.u32 %s1797_s8, 4  ;;  %s94_s2 = int_to_ptr.hbm [resolvable:$true] %s93_s2 }
  0x11   :  { %s80_s18 = sshll.u32 %s1674_s17, 4  ;;  %s1675_s21 = smov 64   ;;  %s81_s18 = int_to_ptr.vmem [resolvable:$true] %s80_s18 }
  0x12   :  { %s1676_s22 = smov 4   ;;  %s1677_s23 = smov [#allocation11]  }
  0x13   :  { %86 = dma.hbm_to_vmem [thread:$0]  %s79_s16, 1024, %s81_s18, [#allocation9], %s1675_s21, %s1675_s21, %s1676_s22  }
  0x14   :  { %s95_s24 = sshll.u32 %s1677_s23, 4  ;;  %s96_s24 = int_to_ptr.vmem [resolvable:$true] %s95_s24 }
  0x15   :  { %101 = dma.hbm_to_vmem [thread:$0]  %s94_s2, 1024, %s96_s24, [#allocation12], %s1675_s21, %s1675_s21, %s1676_s22  }
  0x16   :  { %1656 = dma.done.wait [#allocation3], 512  }
  0x17   :  { %1657 = vsyncadd [#allocation3], 4294966784 }
  0x18   :  { %1658 = dma.done.wait [#allocation6], 6176  }
  0x19   :  { %1659 = vsyncadd [#allocation6], 4294961120 }
  0x1a   :  { %1660 = dma.done.wait [#allocation9], 4096  }
  0x1b   :  { %1661 = vsyncadd [#allocation9], 4294963200 }
  0x1c   :  { %1662 = dma.done.wait [#allocation12], 1024  }
  0x1d   :  { %1663 = vsyncadd [#allocation12], 4294966272  ;;  %v1106_v0 = vld [vmem:[#allocation7 + $0xa8] sm:$0xf]  ;;  %v1396_v1 = vld [vmem:[#allocation7 + $0xb0] sm:$0xf0] }
  0x1e   :  { %v1395_v2 = vld [vmem:[#allocation7 + $0xac] sm:$0xf]  ;;  %v1107_v3 = vor.u32 %v1396_v1, %v1106_v0  ;;  %v1108_v4 = vld [vmem:[#allocation7 + $0xb4] sm:$0xf0]  ;;  %v1094_v9 = vld [vmem:[#allocation7 + $0x90] sm:$0xf] }
  0x1f   :  { %v1419_v5 = vld [vmem:[#allocation7 + $0x16c] sm:$0xf]  ;;  %v1204_v6 = vld [vmem:[#allocation7 + $0x174] sm:$0xf0]  ;;  %v1111_v7 = vor.u32 %v1395_v2, %v1108_v4  ;;  %v1393_v10 = vld [vmem:[#allocation7 + $0x98] sm:$0xf0] }
  0x20   :  { %v1207_v8 = vor.u32 %v1419_v5, %v1204_v6  ;;  %v1392_v11 = vld [vmem:[#allocation7 + $0x94] sm:$0xf]  ;;  %504 = vmatpush.bf16.msra.mxu0 %v1107_v3  ;;  %v1095_v12 = vor.u32 %v1393_v10, %v1094_v9  ;;  %v1096_v13 = vld [vmem:[#allocation7 + $0x9c] sm:$0xf0]  ;;  %v1082_v18 = vld [vmem:[#allocation7 + $0x78] sm:$0xf] }
  0x21   :  { %v1416_v14 = vld [vmem:[#allocation7 + $0x154] sm:$0xf]  ;;  %v1192_v15 = vld [vmem:[#allocation7 + $0x15c] sm:$0xf0]  ;;  %530 = vmatpush.bf16.msra.mxu2 %v1111_v7  ;;  %v1099_v16 = vor.u32 %v1392_v11, %v1096_v13  ;;  %v1390_v19 = vld [vmem:[#allocation7 + $0x80] sm:$0xf0] }
  0x22   :  { %543 = vmatpush.bf16.msra.mxu3 %v1207_v8  ;;  %v1195_v17 = vor.u32 %v1416_v14, %v1192_v15  ;;  %v1389_v20 = vld [vmem:[#allocation7 + $0x7c] sm:$0xf]  ;;  %v1084_v21 = vld [vmem:[#allocation7 + $0x84] sm:$0xf0]  ;;  %v1083_v24 = vor.u32 %v1390_v19, %v1082_v18  ;;  %v1070_v27 = vld [vmem:[#allocation7 + $0x60] sm:$0xf] }
  0x23   :  { %v1413_v22 = vld [vmem:[#allocation7 + $0x13c] sm:$0xf]  ;;  %v1180_v23 = vld [vmem:[#allocation7 + $0x144] sm:$0xf0]  ;;  %v1087_v25 = vor.u32 %v1389_v20, %v1084_v21  ;;  %v1387_v28 = vld [vmem:[#allocation7 + $0x68] sm:$0xf0] }
  0x24   :  { %505 = vmatpush.bf16.msra.mxu0 %v1095_v12  ;;  %v1183_v26 = vor.u32 %v1413_v22, %v1180_v23  ;;  %v1386_v29 = vld [vmem:[#allocation7 + $0x64] sm:$0xf]  ;;  %v1072_v30 = vld [vmem:[#allocation7 + $0x6c] sm:$0xf0]  ;;  %v1202_v33 = vld [vmem:[#allocation7 + $0x168] sm:$0xf]  ;;  %v1071_v34 = vor.u32 %v1387_v28, %v1070_v27 }
  0x25   :  { %531 = vmatpush.bf16.msra.mxu2 %v1099_v16  ;;  %v1410_v31 = vld [vmem:[#allocation7 + $0x124] sm:$0xf]  ;;  %v1168_v32 = vld [vmem:[#allocation7 + $0x12c] sm:$0xf0]  ;;  %v1058_v35 = vld [vmem:[#allocation7 + $0x48] sm:$0xf]  ;;  %v1075_v38 = vor.u32 %v1386_v29, %v1072_v30 }
  0x26   :  { %544 = vmatpush.bf16.msra.mxu3 %v1195_v17  ;;  %v1384_v36 = vld [vmem:[#allocation7 + $0x50] sm:$0xf0]  ;;  %v1171_v39 = vor.u32 %v1410_v31, %v1168_v32  ;;  %v1383_v40 = vld [vmem:[#allocation7 + $0x4c] sm:$0xf]  ;;  %v1060_v41 = vld [vmem:[#allocation7 + $0x54] sm:$0xf0] }
  0x27   :  { %v1420_v37 = vld [vmem:[#allocation7 + $0x170] sm:$0xf0]  ;;  %v1407_v42 = vld [vmem:[#allocation7 + $0x10c] sm:$0xf]  ;;  %v1156_v44 = vld [vmem:[#allocation7 + $0x114] sm:$0xf0]  ;;  %v1059_v48 = vor.u32 %v1384_v36, %v1058_v35  ;;  %v1063_v51 = vor.u32 %v1383_v40, %v1060_v41 }
  0x28   :  { %506 = vmatpush.bf16.msra.mxu0 %v1083_v24  ;;  %v1203_v43 = vor.u32 %v1420_v37, %v1202_v33  ;;  %v1190_v45 = vld [vmem:[#allocation7 + $0x150] sm:$0xf]  ;;  %v1417_v46 = vld [vmem:[#allocation7 + $0x158] sm:$0xf0]  ;;  %v1159_v52 = vor.u32 %v1407_v42, %v1156_v44  ;;  %v1380_v53 = vld [vmem:[#allocation7 + $0x34] sm:$0xf] }
  0x29   :  { %532 = vmatpush.bf16.msra.mxu2 %v1087_v25  ;;  %v1191_v47 = vor.u32 %v1417_v46, %v1190_v45  ;;  %v1046_v49 = vld [vmem:[#allocation7 + $0x30] sm:$0xf]  ;;  %v1381_v50 = vld [vmem:[#allocation7 + $0x38] sm:$0xf0]  ;;  %v1178_v54 = vld [vmem:[#allocation7 + $0x138] sm:$0xf] }
  0x2a   :  { %545 = vmatpush.bf16.msra.mxu3 %v1183_v26  ;;  %517 = vmatpush.bf16.msra.mxu1 %v1203_v43  ;;  %v1414_v55 = vld [vmem:[#allocation7 + $0x140] sm:$0xf0]  ;;  %v1048_v56 = vld [vmem:[#allocation7 + $0x3c] sm:$0xf0]  ;;  %v1404_v57 = vld [vmem:[#allocation7 + $0xf4] sm:$0xf]  ;;  %v1047_v60 = vor.u32 %v1381_v50, %v1046_v49 }
  0x2b   :  { %v1144_v58 = vld [vmem:[#allocation7 + $0xfc] sm:$0xf0]  ;;  %v1179_v59 = vor.u32 %v1414_v55, %v1178_v54  ;;  %v1034_v61 = vld [vmem:[#allocation7 + $0x18] sm:$0xf]  ;;  %v1378_v62 = vld [vmem:[#allocation7 + $0x20] sm:$0xf0]  ;;  %v1051_v63 = vor.u32 %v1380_v53, %v1048_v56 }
  0x2c   :  { %507 = vmatpush.bf16.msra.mxu0 %v1071_v34  ;;  %v1147_v0 = vor.u32 %v1404_v57, %v1144_v58  ;;  %v1377_v1 = vld [vmem:[#allocation7 + $0x1c] sm:$0xf]  ;;  %v1166_v2 = vld [vmem:[#allocation7 + $0x120] sm:$0xf]  ;;  %v1411_v3 = vld [vmem:[#allocation7 + $0x128] sm:$0xf0]  ;;  %v1035_v11 = vor.u32 %v1378_v62, %v1034_v61 }
  0x2d   :  { %533 = vmatpush.bf16.msra.mxu2 %v1075_v38  ;;  %v1036_v4 = vld [vmem:[#allocation7 + $0x24] sm:$0xf0]  ;;  %v1401_v5 = vld [vmem:[#allocation7 + $0xdc] sm:$0xf]  ;;  %v1022_v7 = vld [vmem:[#allocation7] sm:$0xf]  ;;  %v1167_v9 = vor.u32 %v1411_v3, %v1166_v2 }
  0x2e   :  { %546 = vmatpush.bf16.msra.mxu3 %v1171_v39  ;;  %518 = vmatpush.bf16.msra.mxu1 %v1191_v47  ;;  %v1132_v6 = vld [vmem:[#allocation7 + $0xe4] sm:$0xf0]  ;;  %v1375_v8 = vld [vmem:[#allocation7 + $0x8] sm:$0xf0]  ;;  %v1374_v12 = vld [vmem:[#allocation7 + $0x4] sm:$0xf]  ;;  %v1039_v16 = vor.u32 %v1377_v1, %v1036_v4 }
  0x2f   :  { %v1154_v10 = vld [vmem:[#allocation7 + $0x108] sm:$0xf]  ;;  %v1408_v13 = vld [vmem:[#allocation7 + $0x110] sm:$0xf0]  ;;  %v128_v14 = vld [vmem:[#allocation2] sm:$0xff]  ;;  %v1135_v17 = vor.u32 %v1401_v5, %v1132_v6  ;;  %v1023_v31 = vor.u32 %v1375_v8, %v1022_v7  ;;  %vm241_vm0 = vcmask 1041409  }
  0x30   :  { %508 = vmatpush.bf16.msra.mxu0 %v1059_v48  ;;  %v130_v15 = vld [vmem:[#allocation2 + $0x10] sm:$0xff]  ;;  %v1398_v19 = vld [vmem:[#allocation7 + $0xc4] sm:$0xf]  ;;  %v132_v20 = vrot.slane %v128_v14, 4  ;;  %v1397_v24 = vld [vmem:[#allocation7 + $0xb8] sm:$0xf0]  ;;  %v1155_v28 = vor.u32 %v1408_v13, %v1154_v10 }
  0x31   :  { %534 = vmatpush.bf16.msra.mxu2 %v1063_v51  ;;  %v1024_v18 = vld [vmem:[#allocation7 + $0xc] sm:$0xf0]  ;;  %v144_v21 = vrot.slane %v130_v15, 4  ;;  %v1298_v25 = vld [vmem:[#allocation8 + $0xa8] sm:$0xf]  ;;  %s1678_s28 = smov [#allocation13]  }
  0x32   :  { %547 = vmatpush.bf16.msra.mxu3 %v1159_v52  ;;  %519 = vmatpush.bf16.msra.mxu1 %v1179_v59  ;;  %v1120_v22 = vld [vmem:[#allocation7 + $0xcc] sm:$0xf0]  ;;  %v1444_v26 = vld [vmem:[#allocation8 + $0xb0] sm:$0xf0]  ;;  %v1443_v27 = vld [vmem:[#allocation8 + $0xac] sm:$0xf]  ;;  %v133_v29 = vmax.f32 %v128_v14, %v132_v20  ;;  %v1027_v35 = vor.u32 %v1374_v12, %v1024_v18 }
  0x33   :  { %v1114_v23 = vld [vmem:[#allocation7 + $0xb0] sm:$0xf]  ;;  %v145_v30 = vmax.f32 %v130_v15, %v144_v21  ;;  %v1300_v32 = vld [vmem:[#allocation8 + $0xb4] sm:$0xf0]  ;;  %v1405_v34 = vld [vmem:[#allocation7 + $0xf8] sm:$0xf0]  ;;  %v1123_v36 = vor.u32 %v1398_v19, %v1120_v22  ;;  %v1299_v42 = vor.u32 %v1444_v26, %v1298_v25 }
  0x34   :  { %509 = vmatpush.bf16.msra.mxu0 %v1047_v60  ;;  %v1142_v33 = vld [vmem:[#allocation7 + $0xf0] sm:$0xf]  ;;  %v1102_v37 = vld [vmem:[#allocation7 + $0x98] sm:$0xf]  ;;  %v1394_v38 = vld [vmem:[#allocation7 + $0xa0] sm:$0xf0]  ;;  %v1115_v41 = vor.u32 %v1397_v24, %v1114_v23  ;;  %v1303_v46 = vor.u32 %v1443_v27, %v1300_v32 }
  0x35   :  { %535 = vmatpush.bf16.msra.mxu2 %v1051_v63  ;;  %v134_v39 = vrot.slane %v133_v29, 2  ;;  %v146_v40 = vrot.slane %v145_v30, 2  ;;  %v1286_v43 = vld [vmem:[#allocation8 + $0x90] sm:$0xf]  ;;  %v1441_v44 = vld [vmem:[#allocation8 + $0x98] sm:$0xf0]  ;;  %v1143_v50 = vor.u32 %v1405_v34, %v1142_v33  ;;  %v1103_v53 = vor.u32 %v1394_v38, %v1102_v37 }
  0x36   :  { %548 = vmatpush.bf16.msra.mxu3 %v1147_v0  ;;  %520 = vmatpush.bf16.msra.mxu1 %v1167_v9  ;;  %v1440_v45 = vld [vmem:[#allocation8 + $0x94] sm:$0xf]  ;;  %v1288_v47 = vld [vmem:[#allocation8 + $0x9c] sm:$0xf0]  ;;  %v129_v51 = vld [vmem:[#allocation2 + $0x8] sm:$0xff]  ;;  %v1287_v58 = vor.u32 %v1441_v44, %v1286_v43  ;;  %s1005_s29 = sshll.u32 %s1678_s28, 4  ;;  %s1006_s29 = int_to_ptr.vmem [resolvable:$true] %s1005_s29 }
  0x37   :  { %v135_v48 = vmax.f32 %v133_v29, %v134_v39  ;;  %v147_v49 = vmax.f32 %v145_v30, %v146_v40  ;;  %v131_v52 = vld [vmem:[#allocation2 + $0x18] sm:$0xff]  ;;  %v1402_v55 = vld [vmem:[#allocation7 + $0xe0] sm:$0xf0]  ;;  %v138_v56 = vrot.slane %v129_v51, 4  ;;  %v1291_v61 = vor.u32 %v1440_v45, %v1288_v47  ;;  %v1090_v62 = vld [vmem:[#allocation7 + $0x80] sm:$0xf] }
  0x38   :  { %510 = vmatpush.bf16.msra.mxu0 %v1035_v11  ;;  %v1130_v54 = vld [vmem:[#allocation7 + $0xd8] sm:$0xf]  ;;  %v150_v57 = vrot.slane %v131_v52, 4  ;;  %v1391_v63 = vld [vmem:[#allocation7 + $0x88] sm:$0xf0]  ;;  %s1007_s3 = sshll.u32 %s1799_s10, 4  ;;  %s1008_s3 = int_to_ptr.hbm [resolvable:$true] %s1007_s3 }
  0x39   :  { %536 = vmatpush.bf16.msra.mxu2 %v1039_v16  ;;  %v136_v59 = vrot.slane %v135_v48, 1  ;;  %v148_v60 = vrot.slane %v147_v49, 1  ;;  %v1274_v0 = vld [vmem:[#allocation8 + $0x78] sm:$0xf]  ;;  %v139_v1 = vmax.f32 %v129_v51, %v138_v56  ;;  %v1438_v5 = vld [vmem:[#allocation8 + $0x80] sm:$0xf0]  ;;  %v1131_v8 = vor.u32 %v1402_v55, %v1130_v54 }
  0x3a   :  { %549 = vmatpush.bf16.msra.mxu3 %v1135_v17  ;;  %521 = vmatpush.bf16.msra.mxu1 %v1155_v28  ;;  %v151_v2 = vmax.f32 %v131_v52, %v150_v57  ;;  %v1437_v6 = vld [vmem:[#allocation8 + $0x7c] sm:$0xf]  ;;  %v1276_v7 = vld [vmem:[#allocation8 + $0x84] sm:$0xf0]  ;;  %v1118_v11 = vld [vmem:[#allocation7 + $0xc0] sm:$0xf]  ;;  %v1091_v15 = vor.u32 %v1391_v63, %v1090_v62  ;;  %v1275_v19 = vor.u32 %v1438_v5, %v1274_v0 }
  0x3b   :  { %v137_v3 = vmax.f32 %v135_v48, %v136_v59  ;;  %v149_v4 = vmax.f32 %v147_v49, %v148_v60  ;;  %v140_v9 = vrot.slane %v139_v1, 2  ;;  %v1399_v12 = vld [vmem:[#allocation7 + $0xc8] sm:$0xf0]  ;;  %v1078_v16 = vld [vmem:[#allocation7 + $0x68] sm:$0xf]  ;;  %v1279_v27 = vor.u32 %v1437_v6, %v1276_v7 }
  0x3c   :  { %511 = vmatpush.bf16.msra.mxu0 %v1023_v31  ;;  %v152_v10 = vrot.slane %v151_v2, 2  ;;  %v1210_v17 = vld [vmem:[#allocation7 + $0x170] sm:$0xf]  ;;  %v1421_v18 = vld [vmem:[#allocation7 + $0x178] sm:$0xf0]  ;;  %v1119_v28 = vor.u32 %v1399_v12, %v1118_v11 }
  0x3d   :  { %537 = vmatpush.bf16.msra.mxu2 %v1027_v35  ;;  %v157_v13 = vpack.c.bf16 %v137_v3, %v137_v3  ;;  %v159_v14 = vpack.c.bf16 %v149_v4, %v149_v4  ;;  %v1388_v20 = vld [vmem:[#allocation7 + $0x70] sm:$0xf0]  ;;  %v1262_v21 = vld [vmem:[#allocation8 + $0x60] sm:$0xf]  ;;  %v1435_v22 = vld [vmem:[#allocation8 + $0x68] sm:$0xf0]  ;;  %v141_v23 = vmax.f32 %v139_v1, %v140_v9  ;;  %v1211_v33 = vor.u32 %v1421_v18, %v1210_v17 }
  0x3e   :  { %550 = vmatpush.bf16.msra.mxu3 %v1123_v36  ;;  %522 = vmatpush.bf16.msra.mxu1 %v1143_v50  ;;  %v153_v24 = vmax.f32 %v151_v2, %v152_v10  ;;  %v1434_v29 = vld [vmem:[#allocation8 + $0x64] sm:$0xf]  ;;  %v1264_v30 = vld [vmem:[#allocation8 + $0x6c] sm:$0xf0]  ;;  %v1079_v35 = vor.u32 %v1388_v20, %v1078_v16  ;;  %v1263_v36 = vor.u32 %v1435_v22, %v1262_v21  ;;  %v1198_v37 = vld [vmem:[#allocation7 + $0x158] sm:$0xf] }
  0x3f   :  { %v237_v25 = vunpack.c.l.b16 %v157_v13  ;;  %v239_v26 = vunpack.c.l.b16 %v159_v14  ;;  %v142_v31 = vrot.slane %v141_v23, 1  ;;  %v1418_v38 = vld [vmem:[#allocation7 + $0x160] sm:$0xf0]  ;;  %v1267_v43 = vor.u32 %v1434_v29, %v1264_v30  ;;  %v1385_v44 = vld [vmem:[#allocation7 + $0x58] sm:$0xf0] }
  0x40   :  { %556 = vmatpush.bf16.msrb.mxu0 %v1115_v41  ;;  %v154_v32 = vrot.slane %v153_v24, 1  ;;  %v1250_v45 = vld [vmem:[#allocation8 + $0x48] sm:$0xf]  ;;  %v1431_v49 = vld [vmem:[#allocation8 + $0x4c] sm:$0xf]  ;;  %v1199_v50 = vor.u32 %v1418_v38, %v1198_v37 }
  0x41   :  { %743 = vmatpush.bf16.msrb.mxu2 %v1299_v42  ;;  %v242_v34 = vsel %vm241_vm0, %v239_v26, %v237_v25  ;;  %v143_v40 = vmax.f32 %v141_v23, %v142_v31  ;;  %v1066_v42 = vld [vmem:[#allocation7 + $0x50] sm:$0xf]  ;;  %v1252_v51 = vld [vmem:[#allocation8 + $0x54] sm:$0xf0]  ;;  %v1186_v52 = vld [vmem:[#allocation7 + $0x140] sm:$0xf] }
  0x42   :  { %756 = vmatpush.bf16.msrb.mxu3 %v1303_v46  ;;  %523 = vmatpush.bf16.msra.mxu1 %v1131_v8  ;;  %v1753_v39 = vpack.c.b16 %v242_v34, %v242_v34  ;;  %v155_v41 = vmax.f32 %v153_v24, %v154_v32  ;;  %v1432_v46 = vld [vmem:[#allocation8 + $0x50] sm:$0xf0]  ;;  %v1067_v56 = vor.u32 %v1385_v44, %v1066_v42  ;;  %v1382_v59 = vld [vmem:[#allocation7 + $0x40] sm:$0xf0]  ;;  %v1238_v60 = vld [vmem:[#allocation8 + $0x30] sm:$0xf] }
  0x43   :  { %v158_v47 = vpack.c.bf16 %v143_v40, %v143_v40  ;;  %v1251_v57 = vor.u32 %v1432_v46, %v1250_v45  ;;  %v1255_v63 = vor.u32 %v1431_v49, %v1252_v51  ;;  %v1428_v0 = vld [vmem:[#allocation8 + $0x34] sm:$0xf]  ;;  %v1240_v3 = vld [vmem:[#allocation8 + $0x3c] sm:$0xf0]  ;;  %v1174_v4 = vld [vmem:[#allocation7 + $0x128] sm:$0xf] }
  0x44   :  { %557 = vmatpush.bf16.msrb.mxu0 %v1103_v53  ;;  %538 = vmatmul.bf16.vlgmr.msra.gmra.mxu2 %v1753_v39  ;;  %v160_v48 = vpack.c.bf16 %v155_v41, %v155_v41  ;;  %v1415_v53 = vld [vmem:[#allocation7 + $0x148] sm:$0xf0]  ;;  %v1412_v5 = vld [vmem:[#allocation7 + $0x130] sm:$0xf0]  ;;  %v1042_v8 = vld [vmem:[#allocation7 + $0x20] sm:$0xf]  ;;  %v1243_v13 = vor.u32 %v1428_v0, %v1240_v3 }
  0x45   :  { %744 = vmatpush.bf16.msrb.mxu2 %v1287_v58  ;;  %512 = vmatmul.bf16.vlgmr.msra.gmra.mxu0 %v1753_v39  ;;  %v238_v54 = vunpack.c.l.b16 %v158_v47  ;;  %v1054_v58 = vld [vmem:[#allocation7 + $0x38] sm:$0xf]  ;;  %v1187_v1 = vor.u32 %v1415_v53, %v1186_v52  ;;  %v1379_v9 = vld [vmem:[#allocation7 + $0x28] sm:$0xf0]  ;;  %v1426_v11 = vld [vmem:[#allocation8 + $0x20] sm:$0xf0]  ;;  %v1175_v14 = vor.u32 %v1412_v5, %v1174_v4 }
  0x46   :  { %757 = vmatpush.bf16.msrb.mxu3 %v1291_v61  ;;  %524 = vmatpush.bf16.msra.mxu1 %v1119_v28  ;;  %v240_v55 = vunpack.c.l.b16 %v160_v48  ;;  %v1429_v61 = vld [vmem:[#allocation8 + $0x38] sm:$0xf0]  ;;  %v1055_v6 = vor.u32 %v1382_v59, %v1054_v58  ;;  %v1226_v10 = vld [vmem:[#allocation8 + $0x18] sm:$0xf]  ;;  %v1162_v16 = vld [vmem:[#allocation7 + $0x110] sm:$0xf]  ;;  %v1043_v18 = vor.u32 %v1379_v9, %v1042_v8 }
  0x47   :  { %v1239_v7 = vor.u32 %v1429_v61, %v1238_v60  ;;  %v1425_v12 = vld [vmem:[#allocation8 + $0x1c] sm:$0xf]  ;;  %v1030_v20 = vld [vmem:[#allocation7 + $0x8] sm:$0xf]  ;;  %v1376_v21 = vld [vmem:[#allocation7 + $0x10] sm:$0xf0] }
  0x48   :  { %558 = vmatpush.bf16.msrb.mxu0 %v1091_v15  ;;  %v243_v62 = vsel %vm241_vm0, %v240_v55, %v238_v54  ;;  %v1228_v15 = vld [vmem:[#allocation8 + $0x24] sm:$0xf0]  ;;  %v1409_v17 = vld [vmem:[#allocation7 + $0x118] sm:$0xf0]  ;;  %v1214_v22 = vld [vmem:[#allocation8] sm:$0xf]  ;;  %v1031_v32 = vor.u32 %v1376_v21, %v1030_v20 }
  0x49   :  { %745 = vmatpush.bf16.msrb.mxu2 %v1275_v19  ;;  %v1758_v2 = vpack.c.b16 %v243_v62, %v243_v62  ;;  %v1227_v19 = vor.u32 %v1426_v11, %v1226_v10  ;;  %v1423_v23 = vld [vmem:[#allocation8 + $0x8] sm:$0xf0]  ;;  %v1231_v24 = vor.u32 %v1425_v12, %v1228_v15  ;;  %v1422_v25 = vld [vmem:[#allocation8 + $0x4] sm:$0xf]  ;;  %v1306_v26 = vld [vmem:[#allocation8 + $0xb0] sm:$0xf]  ;;  %v1163_v28 = vor.u32 %v1409_v17, %v1162_v16 }
  0x4a   :  { %758 = vmatpush.bf16.msrb.mxu3 %v1279_v27  ;;  %569 = vmatpush.bf16.msrb.mxu1 %v1211_v33  ;;  %v1445_v27 = vld [vmem:[#allocation8 + $0xb8] sm:$0xf0]  ;;  %v1216_v29 = vld [vmem:[#allocation8 + $0xc] sm:$0xf0]  ;;  %v1150_v30 = vld [vmem:[#allocation7 + $0xf8] sm:$0xf]  ;;  %v1215_v33 = vor.u32 %v1423_v23, %v1214_v22 }
  0x4b   :  { %551 = vmatmul.bf16.vlgmr.msra.gmra.mxu3 %v1758_v2  ;;  %525 = vmatmul.bf16.vlgmr.msra.gmra.mxu1 %v1758_v2  ;;  %v1406_v31 = vld [vmem:[#allocation7 + $0x100] sm:$0xf0]  ;;  %v1762_v34 = vld [vmem:[#allocation5] sm:$0x3]  ;;  %v1294_v37 = vld [vmem:[#allocation8 + $0x98] sm:$0xf] }
  0x4c   :  { %559 = vmatpush.bf16.msrb.mxu0 %v1079_v35  ;;  %v1307_v35 = vor.u32 %v1445_v27, %v1306_v26  ;;  %v1442_v38 = vld [vmem:[#allocation8 + $0xa0] sm:$0xf0]  ;;  %v1151_v40 = vor.u32 %v1406_v31, %v1150_v30  ;;  %v582_v41 = vpack.c.bf16 %v1762_v34, %v1762_v34  ;;  %v1138_v42 = vld [vmem:[#allocation7 + $0xe0] sm:$0xf]  ;;  %v1439_v46 = vld [vmem:[#allocation8 + $0x88] sm:$0xf0] }
  0x4d   :  { %746 = vmatpush.bf16.msrb.mxu2 %v1263_v36  ;;  %v1219_v36 = vor.u32 %v1422_v25, %v1216_v29  ;;  %v1295_v44 = vor.u32 %v1442_v38, %v1294_v37  ;;  %v1282_v45 = vld [vmem:[#allocation8 + $0x80] sm:$0xf]  ;;  %v1126_v48 = vld [vmem:[#allocation7 + $0xc8] sm:$0xf]  ;;  %v1400_v49 = vld [vmem:[#allocation7 + $0xd0] sm:$0xf0] }
  0x4e   :  { %759 = vmatpush.bf16.msrb.mxu3 %v1267_v43  ;;  %570 = vmatpush.bf16.msrb.mxu1 %v1199_v50  ;;  %v1403_v43 = vld [vmem:[#allocation7 + $0xe8] sm:$0xf0]  ;;  %v1283_v50 = vor.u32 %v1439_v46, %v1282_v45  ;;  %v1270_v51 = vld [vmem:[#allocation8 + $0x68] sm:$0xf]  ;;  %v1436_v52 = vld [vmem:[#allocation8 + $0x70] sm:$0xf0]  ;;  %v1127_v53 = vor.u32 %v1400_v49, %v1126_v48 }
  0x4f   :  { %v1139_v47 = vor.u32 %v1403_v43, %v1138_v42  ;;  %v1271_v54 = vor.u32 %v1436_v52, %v1270_v51  ;;  %v1258_v55 = vld [vmem:[#allocation8 + $0x50] sm:$0xf]  ;;  %v1246_v58 = vld [vmem:[#allocation8 + $0x38] sm:$0xf]  ;;  %v1234_v60 = vld [vmem:[#allocation8 + $0x20] sm:$0xf] }
  0x50   :  { %560 = vmatpush.bf16.msrb.mxu0 %v1067_v56  ;;  %v1433_v56 = vld [vmem:[#allocation8 + $0x58] sm:$0xf0]  ;;  %v1427_v61 = vld [vmem:[#allocation8 + $0x28] sm:$0xf0]  ;;  %v1424_v0 = vld [vmem:[#allocation8 + $0x10] sm:$0xf0] }
  0x51   :  { %747 = vmatpush.bf16.msrb.mxu2 %v1251_v57  ;;  %v1259_v57 = vor.u32 %v1433_v56, %v1258_v55  ;;  %v1235_v62 = vor.u32 %v1427_v61, %v1234_v60  ;;  %v1771_v9 = vld [vmem:[%s1793_s4] sm:$0x7]  ;;  %v1452_v12 = vld [vmem:[#allocation10 + $0x30] sm:$0xff]  ;;  %v1451_v17 = vld [vmem:[#allocation10 + $0x28] sm:$0xff] }
  0x52   :  { %760 = vmatpush.bf16.msrb.mxu3 %v1255_v63  ;;  %571 = vmatpush.bf16.msrb.mxu1 %v1187_v1  ;;  %v1222_v63 = vld [vmem:[#allocation8 + $0x8] sm:$0xf]  ;;  %v227_v11 = vperm.slane %v1771_v9, 0  ;;  %v1450_v20 = vld [vmem:[#allocation10 + $0x20] sm:$0xff]  ;;  %v1449_v26 = vld [vmem:[#allocation10 + $0x18] sm:$0xff]  ;;  %v229_v48 = vperm.slane %v1771_v9, 2 }
  0x53   :  { %v1223_v1 = vor.u32 %v1424_v0, %v1222_v63  ;;  %v1448_v30 = vld [vmem:[#allocation10 + $0x10] sm:$0xff]  ;;  %v1461_v43 = vld [vmem:[#allocation11 + $0x38] sm:$0xff]  ;;  %v1459_v49 = vld [vmem:[#allocation11 + $0x28] sm:$0xff] }
  0x54   :  { %561 = vmatpush.bf16.msrb.mxu0 %v1055_v6 }
  0x55   :  { %748 = vmatpush.bf16.msrb.mxu2 %v1239_v7 }
  0x56   :  { %761 = vmatpush.bf16.msrb.mxu3 %v1243_v13  ;;  %572 = vmatpush.bf16.msrb.mxu1 %v1175_v14  ;;  %v228_v13 = vperm.slane %v1771_v9, 1 }
  0x58   :  { %562 = vmatpush.bf16.msrb.mxu0 %v1043_v18 }
  0x59   :  { %749 = vmatpush.bf16.msrb.mxu2 %v1227_v19 }
  0x5a   :  { %762 = vmatpush.bf16.msrb.mxu3 %v1231_v24  ;;  %573 = vmatpush.bf16.msrb.mxu1 %v1163_v28 }
  0x5c   :  { %563 = vmatpush.bf16.msrb.mxu0 %v1031_v32 }
  0x5d   :  { %750 = vmatpush.bf16.msrb.mxu2 %v1215_v33  ;;  %v1447_v33 = vld [vmem:[#allocation10 + $0x8] sm:$0xff] }
  0x5e   :  { %763 = vmatpush.bf16.msrb.mxu3 %v1219_v36  ;;  %574 = vmatpush.bf16.msrb.mxu1 %v1151_v40  ;;  %v1446_v40 = vld [vmem:[#allocation10] sm:$0xff] }
  0x5f   :  { %564 = vmatmul.bf16.vlgmr.msrb.gmra.mxu0 %v1753_v39  ;;  %v1430_v39 = vld [vmem:[#allocation8 + $0x40] sm:$0xf0] }
  0x60   :  { %769 = vmatpush.bf16.msra.mxu0 %v1307_v35  ;;  %751 = vmatmul.bf16.vlgmr.msrb.gmra.mxu2 %v582_v41  ;;  %v1247_v59 = vor.u32 %v1430_v39, %v1246_v58  ;;  %v1458_v39 = vld [vmem:[#allocation11 + $0x20] sm:$0xff] }
  0x61   :  { %764 = vmatmul.bf16.vlgmr.msrb.gmra.mxu3 %v582_v41  ;;  %986 = vmatpush.bf16.msra.mxu2 %v1461_v43 }
  0x62   :  { %575 = vmatpush.bf16.msrb.mxu1 %v1139_v47 }
  0x64   :  { %770 = vmatpush.bf16.msra.mxu0 %v1295_v44  ;;  %v1460_v44 = vld [vmem:[#allocation11 + $0x30] sm:$0xff] }
  0x65   :  { %987 = vmatpush.bf16.msra.mxu2 %v1460_v44 }
  0x66   :  { %576 = vmatpush.bf16.msrb.mxu1 %v1127_v53  ;;  %v1475_v53 = vld [vmem:[%s1794_s5] ss:$0 sm:$0xff] }
  0x68   :  { %771 = vmatpush.bf16.msra.mxu0 %v1283_v50 }
  0x69   :  { %577 = vmatmul.bf16.vlgmr.msrb.gmra.mxu1 %v1758_v2  ;;  %v1453_v2 = vld [vmem:[#allocation10 + $0x38] sm:$0xff]  ;;  %988 = vmatpush.bf16.msra.mxu2 %v1459_v49 }
  0x6a   :  { %903 = vmatpush.bf16.msra.mxu1 %v1453_v2 }
  0x6c   :  { %772 = vmatpush.bf16.msra.mxu0 %v1271_v54 }
  0x6d   :  { %989 = vmatpush.bf16.msra.mxu2 %v1458_v39 }
  0x6e   :  { %904 = vmatpush.bf16.msra.mxu1 %v1452_v12 }
  0x70   :  { %773 = vmatpush.bf16.msra.mxu0 %v1259_v57 }
  0x72   :  { %905 = vmatpush.bf16.msra.mxu1 %v1451_v17 }
  0x74   :  { %774 = vmatpush.bf16.msra.mxu0 %v1247_v59 }
  0x76   :  { %906 = vmatpush.bf16.msra.mxu1 %v1450_v20  ;;  %v1454_v20 = vld [vmem:[#allocation11] sm:$0xff] }
  0x78   :  { %775 = vmatpush.bf16.msra.mxu0 %v1235_v62 }
  0x7a   :  { %907 = vmatpush.bf16.msra.mxu1 %v1449_v26 }
  0x7c   :  { %776 = vmatpush.bf16.msra.mxu0 %v1223_v1 }
  0x7e   :  { %908 = vmatpush.bf16.msra.mxu1 %v1448_v30 }
  0x7f   :  { %777 = vmatmul.bf16.vlgmr.msra.gmra.mxu0 %v582_v41 }
  0x82   :  { %909 = vmatpush.bf16.msra.mxu1 %v1447_v33 }
  0x86   :  { %910 = vmatpush.bf16.msra.mxu1 %v1446_v40 }
  0xc2   :  { %v513_v3 = vpop.f32.mrf.mxu0 }
  0xc3   :  { %v514_v14 = vadd.f32 %v513_v3, %v227_v11  ;;  %v1457_v3 = vld [vmem:[#allocation11 + $0x18] sm:$0xff] }
  0xc4   :  { %990 = vmatpush.bf16.msra.mxu2 %v1457_v3 }
  0xc7   :  { %v539_v4 = vpop.f32.mrf.mxu2 }
  0xc8   :  { %v526_v5 = vpop.f32.mrf.mxu1  ;;  %v540_v18 = vadd.f32 %v539_v4, %v228_v13 }
  0xc9   :  { %v527_v19 = vadd.f32 %v526_v5, %v514_v14 }
  0xca   :  { %v515_v6 = vpop.f32.mrf.mxu0 }
  0xce   :  { %v552_v7 = vpop.f32.mrf.mxu3 }
  0xcf   :  { %v541_v8 = vpop.f32.mrf.mxu2  ;;  %v553_v22 = vadd.f32 %v552_v7, %v540_v18 }
  0xd0   :  { %v528_v10 = vpop.f32.mrf.mxu1 }
  0xd1   :  { %v1456_v10 = vld [vmem:[#allocation11 + $0x10] sm:$0xff] }
  0xd2   :  { %991 = vmatpush.bf16.msra.mxu2 %v1456_v10 }
  0xd6   :  { %v554_v15 = vpop.f32.mrf.mxu3 }
  0xdc   :  { %v565_v16 = vpop.f32.mrf.mxu0 }
  0xdd   :  { %v566_v58 = vadd.f32 %v565_v16, %v229_v48 }
  0xe3   :  { %v752_v21 = vpop.f32.mrf.mxu2 }
  0xe4   :  { %v782_v23 = vadd.f32 %v752_v21, %v527_v19  ;;  %v765_v24 = vpop.f32.mrf.mxu3  ;;  %v567_v25 = vpop.f32.mrf.mxu0  ;;  %v1455_v19 = vld [vmem:[#allocation11 + $0x8] sm:$0xff]  ;;  %v1476_v21 = vld [vmem:[%s1796_s7] ss:$0 sm:$0xff] }
  0xe5   :  { %v783_v28 = vadd.f32 %v765_v24, %v553_v22  ;;  %992 = vmatpush.bf16.msra.mxu2 %v1455_v19 }
  0xe6   :  { %v1308_v27 = vmul.f32 -1.442695, %v782_v23  ;;  %v578_v29 = vpop.f32.mrf.mxu1 }
  0xe7   :  { %v1309_v31 = vmul.f32 -1.442695, %v783_v28  ;;  %v579_v5 = vadd.f32 %v578_v29, %v566_v58 }
  0xe8   :  { %1478 = vpow2.f32 %v1308_v27 }
  0xe9   :  { %1480 = vpow2.f32 %v1309_v31  ;;  %993 = vmatpush.bf16.msra.mxu2 %v1454_v20 }
  0xeb   :  { %v754_v32 = vpop.f32.mrf.mxu2 }
  0xec   :  { %v767_v35 = vpop.f32.mrf.mxu3 }
  0xee   :  { %v1479_v36 = vpop.eup %1478  ;;  %v580_v38 = vpop.f32.mrf.mxu1 }
  0xef   :  { %v790_v37 = vadd.f32 1.0, %v1479_v36  ;;  %v1481_v41 = vpop.eup %1480 }
  0xf0   :  { %v791_v42 = vadd.f32 1.0, %v1481_v41 }
  0xf1   :  { %1482 = vrcp.f32 %v790_v37  ;;  %v803_v54 = vand.u32 2147483648, %v790_v37  ;;  %v801_v57 = vand.u32 2147483647, %v790_v37  ;;  %vm797_vm2 = vweird.f32 %v790_v37 }
  0xf2   :  { %1484 = vrcp.f32 %v791_v42  ;;  %v818_v4 = vand.u32 2147483648, %v791_v42  ;;  %vm812_vm6 = vweird.f32 %v791_v42  ;;  %v816_v2 = vand.u32 2147483647, %v791_v42 }
  0xf3   :  { %v804_v62 = vor.u32 1.1754944e-38, %v803_v54  ;;  %vm802_vm4 = vcmp.eq.f32.partialorder %v801_v57, 8.507059e+37 }
  0xf4   :  { %v819_v11 = vor.u32 1.1754944e-38, %v818_v4  ;;  %vm817_vm8 = vcmp.eq.f32.partialorder %v816_v2, 8.507059e+37 }
  0xf7   :  { %v1483_v45 = vpop.eup %1482 }
  0xf8   :  { %v793_v46 = vmul.f32 %v1483_v45, %v790_v37  ;;  %v1485_v47 = vpop.eup %1484  ;;  %vm798_vm1 = vweird.f32 %v1483_v45 }
  0xf9   :  { %v808_v50 = vmul.f32 %v1485_v47, %v791_v42  ;;  %vm799_vm3 = vmor %vm797_vm2, %vm798_vm1  ;;  %vm813_vm5 = vweird.f32 %v1485_v47 }
  0xfa   :  { %v794_v52 = vsub.f32 1.0, %v793_v46  ;;  %vm814_vm7 = vmor %vm812_vm6, %vm813_vm5 }
  0xfb   :  { %v809_v55 = vsub.f32 1.0, %v808_v50 }
  0xfc   :  { %v778_v51 = vpop.f32.mrf.mxu0  ;;  %v795_v56 = vmul.f32 %v1483_v45, %v794_v52 }
  0xfd   :  { %v810_v59 = vmul.f32 %v1485_v47, %v809_v55  ;;  %v826_v61 = vadd.f32 %v1475_v53, %v778_v51 }
  0xfe   :  { %v796_v60 = vadd.f32 %v1483_v45, %v795_v56 }
  0xff   :  { %v811_v1 = vadd.f32 %v1485_v47, %v810_v59 }
 0x100   :  { %v800_v63 = vsel %vm799_vm3, %v1483_v45, %v796_v60 }
 0x101   :  { %v805_v0 = vsel %vm802_vm4, %v804_v62, %v800_v63  ;;  %v815_v9 = vsel %vm814_vm7, %v1485_v47, %v811_v1 }
 0x102   :  { %v827_v6 = vmul.f32 %v826_v61, %v805_v0  ;;  %v820_v12 = vsel %vm817_vm8, %v819_v11, %v815_v9 }
 0x103   :  { %v830_v13 = vsub.f32 1.0, %v820_v12  ;;  %v832_v16 = vmul.f32 %v820_v12, %v1762_v34  ;;  %v1477_v34 = vld [vmem:[%s1798_s9] ss:$0 sm:$0xff] }
 0x104   :  { %v780_v7 = vpop.f32.mrf.mxu0  ;;  %v828_v8 = vadd.f32 %v827_v6, %v579_v5 }
 0x106   :  { %1486 = vtanh.f32 %v828_v8 }
 0x10c   :  { %v1487_v14 = vpop.eup %1486 }
 0x10d   :  { %v831_v15 = vmul.f32 %v1487_v14, %v830_v13 }
 0x10f   :  { %v833_v17 = vadd.f32 %v832_v16, %v831_v15 }
 0x111   :  { %v834_v18 = vpack.c.bf16 %v833_v17, %v833_v17 }
 0x113   :  { %911 = vmatmul.bf16.vlgmr.msra.gmra.mxu1 %v834_v18 }
 0x190   :  { %v912_v22 = vpop.f32.mrf.mxu1 }
 0x191   :  { %v913_v23 = vadd.f32 %v1476_v21, %v912_v22 }
 0x193   :  { %v916_v24 = vmax.f32 %v913_v23, 0.0 }
 0x195   :  { %v917_v25 = vpack.c.bf16 %v916_v24, %v916_v24 }
 0x197   :  { %994 = vmatmul.bf16.vlgmr.msra.gmra.mxu2 %v917_v25 }
 0x198   :  { %v914_v26 = vpop.f32.mrf.mxu1 }
 0x21a   :  { %v995_v27 = vpop.f32.mrf.mxu2 }
 0x21b   :  { %v996_v28 = vadd.f32 %v1477_v34, %v995_v27 }
 0x21d   :  { %999 = vst [vmem:[#allocation13] sm:$0x3] %v996_v28 }
 0x21e   :  { %1010 = dma.vmem_to_hbm [thread:$0]  %s1006_s29, 32, %s1008_s3, [#allocation4]  }
 0x222   :  { %v997_v29 = vpop.f32.mrf.mxu2 }
 0x223   :  { %1664 = dma.done.wait [#allocation4], 32  }
 0x224   :  { %1665 = vsyncadd [#allocation4], 4294967264 }
 0x225   :  { %1015 = vsyncpa [#allocation3], 1 }
 0x226   :  { %1016 = vsyncpa [#allocation6], 1 }
 0x227   :  { %1017 = vsyncpa [#allocation9], 1 }
 0x228   :  { %1018 = vsyncpa [#allocation12], 1 }
 0x229   :  { %1019 = vsyncpa [#allocation4], 1 }

</bundles_post_ra>
